<compile_context>
chip_gen: v6e
topology: v6e:2x2x1
jax: 0.10.0
libtpu: 0.0.40
codegen_flags: <defaults>
</compile_context>

<pallas_src>
import functools
import math

import jax
import jax.numpy as jnp
from jax.experimental import pallas as pl
from jax.experimental.pallas import tpu as pltpu


def _round_up(x, m):
    return ((x + m - 1) // m) * m


def _kd_soft_ce_row_kernel(y_pred_ref, y_gt_ref, row_loss_ref, *,
                           inv_T, tile_b, n_valid_rows, need_mask):
    # Upcast to f32 inside the kernel (HBM traffic stays in the source dtype).
    yp = y_pred_ref[...].astype(jnp.float32) * inv_T          # (tile_b, C)
    yg = y_gt_ref[...].astype(jnp.float32) * inv_T             # (tile_b, C)

    # log-sum-exp of (y_pred / T), numerically stable, per row.
    p_max = jnp.max(yp, axis=-1, keepdims=True)                 # (tile_b, 1)
    p_shift = yp - p_max                                        # (tile_b, C)
    lse = jnp.log(jnp.sum(jnp.exp(p_shift), axis=-1, keepdims=True))  # (tile_b, 1)

    # Unnormalized softmax weights of (y_gt / T).
    g_max = jnp.max(yg, axis=-1, keepdims=True)                 # (tile_b, 1)
    g_exp = jnp.exp(yg - g_max)                                 # (tile_b, C)
    g_sum = jnp.sum(g_exp, axis=-1, keepdims=True)              # (tile_b, 1)
    w_dot = jnp.sum(g_exp * p_shift, axis=-1, keepdims=True)    # (tile_b, 1)

    # Per-row cross-entropy: sum_c softmax(g) * (lse - p_shift)
    #   = lse - (sum_c g_exp * p_shift) / sum_c g_exp      (since sum softmax == 1)
    # The reciprocal acts only on (tile_b, 1) scalars; approx -> EUP, g_sum >= 1.
    row_ce = lse - w_dot * pl.reciprocal(g_sum, approx=True)    # (tile_b, 1)

    if need_mask:
        rows = (jax.lax.broadcasted_iota(jnp.int32, (tile_b, 1), 0)
                + pl.program_id(0) * tile_b)
        row_ce = jnp.where(rows < n_valid_rows, row_ce, 0.0)

    row_loss_ref[...] = row_ce


def _choose_tile_b(B, C, itemsize):
    # Sublane alignment: f32 -> 8, bf16/f16 -> 16, int8/fp8 -> 32.
    sub = 8 if itemsize >= 4 else (16 if itemsize == 2 else 32)
    # ~2 MiB per input tile: 2 inputs x 2 pipeline buffers ~= 8 MiB VMEM,
    # safely under the default scoped limit on v5e (16 MiB) and v6e/v7x (32 MiB).
    budget_bytes = 2 * 1024 * 1024
    rows = max(sub, budget_bytes // max(C * itemsize, 1))
    rows = max(sub, (rows // sub) * sub)
    rows = min(rows, _round_up(B, sub))
    return max(sub, (rows // sub) * sub)


def cross_entropy_loss_for_soft_target(y_pred, y_gt, T=3.0, alpha=2.0):
    """Pallas implementation of CrossEntropyLossForSoftTarget.forward."""
    assert y_pred.shape == y_gt.shape
    assert y_pred.dtype == y_gt.dtype

    orig_shape = y_pred.shape
    C = orig_shape[-1]
    B = max(1, math.prod(orig_shape[:-1]))
    n_elems = float(B * C)

    yp2 = jnp.reshape(y_pred, (B, C))
    yg2 = jnp.reshape(y_gt, (B, C))

    itemsize = jnp.dtype(y_pred.dtype).itemsize
    tile_b = _choose_tile_b(B, C, itemsize)
    B_pad = _round_up(B, tile_b)
    need_mask = B_pad != B
    if need_mask:
        yp2 = jnp.pad(yp2, ((0, B_pad - B), (0, 0)))
        yg2 = jnp.pad(yg2, ((0, B_pad - B), (0, 0)))

    num_tiles = B_pad // tile_b

    kernel = functools.partial(
        _kd_soft_ce_row_kernel,
        inv_T=1.0 / float(T),
        tile_b=tile_b,
        n_valid_rows=B,
        need_mask=need_mask,
    )

    row_losses = pl.pallas_call(
        kernel,
        out_shape=jax.ShapeDtypeStruct((B_pad, 1), jnp.float32),
        grid=(num_tiles,),
        in_specs=[
            pl.BlockSpec((tile_b, C), lambda i: (i, 0)),
            pl.BlockSpec((tile_b, C), lambda i: (i, 0)),
        ],
        out_specs=pl.BlockSpec((tile_b, 1), lambda i: (i, 0)),
        compiler_params=pltpu.CompilerParams(
            dimension_semantics=("parallel",),
        ),
    )(yp2, yg2)

    # Tiny final reduction + scale in JAX (padded rows contribute exactly 0).
    return (float(alpha) / n_elems) * jnp.sum(row_losses)


def _reference(y_pred, y_gt, T=3.0, alpha=2.0):
    yp = y_pred.astype(jnp.float32) / T
    yg = y_gt.astype(jnp.float32) / T
    return -(jax.nn.softmax(yg, axis=-1) * jax.nn.log_softmax(yp, axis=-1)).mean() * alpha


if __name__ == "__main__":
    key = jax.random.PRNGKey(0)
    k1, k2, k3, k4 = jax.random.split(key, 4)

    # Case 1: small f32 logits (batch divisible by the sublane tile).
    batch, num_classes = 8, 32
    y_pred = jax.random.normal(k1, (batch, num_classes), dtype=jnp.float32)
    y_gt = jax.random.normal(k2, (batch, num_classes), dtype=jnp.float32)

    loss = cross_entropy_loss_for_soft_target(y_pred, y_gt, T=3.0, alpha=2.0)
    loss = jax.block_until_ready(loss)
    ref = _reference(y_pred, y_gt, T=3.0, alpha=2.0)
    assert jnp.allclose(loss, ref, rtol=2e-3, atol=1e-5), (loss, ref)

    # Case 2: bf16 inputs with a batch that needs padding/masking (exercises
    # the padded-row mask and the reduced-precision HBM path).
    batch2, num_classes2 = 13, 160
    y_pred_b = jax.random.normal(k3, (batch2, num_classes2), dtype=jnp.bfloat16)
    y_gt_b = jax.random.normal(k4, (batch2, num_classes2), dtype=jnp.bfloat16)

    loss_b = cross_entropy_loss_for_soft_target(y_pred_b, y_gt_b, T=3.0, alpha=2.0)
    loss_b = jax.block_until_ready(loss_b)
    ref_b = _reference(y_pred_b, y_gt_b, T=3.0, alpha=2.0)
    assert jnp.allclose(loss_b, ref_b, rtol=1e-2, atol=1e-4), (loss_b, ref_b)

    print("KERNEL_OK")
</pallas_src>

<mosaic_0001>
module attributes {stable_mosaic.version = 11 : i64} {
  func.func @_kd_soft_ce_row_kernel(%arg0: i32, %arg1: memref<8x32xf32, #tpu.memory_space<vmem>>, %arg2: memref<8x32xf32, #tpu.memory_space<vmem>>, %arg3: memref<8x1xf32, #tpu.memory_space<vmem>>) attributes {dimension_semantics = [#tpu.dimension_semantics<parallel>], iteration_bounds = array<i64: 1>, scalar_prefetch = 0 : i64, scratch_operands = 0 : i64, tpu.core_type = #tpu.core_type<tc>, window_params = [{transform_indices = @transform_0, window_bounds = array<i64: 8, 32>}, {transform_indices = @transform_1, window_bounds = array<i64: 8, 32>}, {transform_indices = @transform_2, window_bounds = array<i64: 8, 1>}]} {
    %c0 = arith.constant 0 : index
    %c0_0 = arith.constant 0 : index
    %0 = vector.load %arg1[%c0, %c0_0] : memref<8x32xf32, #tpu.memory_space<vmem>>, vector<8x32xf32>
    %cst = arith.constant 0.333333343 : f32
    %1 = vector.broadcast %cst : f32 to vector<8x32xf32>
    %2 = arith.mulf %0, %1 : vector<8x32xf32>
    %c0_1 = arith.constant 0 : index
    %c0_2 = arith.constant 0 : index
    %3 = vector.load %arg2[%c0_1, %c0_2] : memref<8x32xf32, #tpu.memory_space<vmem>>, vector<8x32xf32>
    %cst_3 = arith.constant 0.333333343 : f32
    %4 = vector.broadcast %cst_3 : f32 to vector<8x32xf32>
    %5 = arith.mulf %3, %4 : vector<8x32xf32>
    %cst_4 = arith.constant dense<0xFF800000> : vector<8xf32>
    %6 = vector.multi_reduction <maximumf>, %2, %cst_4 [1] : vector<8x32xf32> to vector<8xf32>
    %7 = vector.shape_cast %6 : vector<8xf32> to vector<8x1xf32>
    %8 = vector.broadcast %7 : vector<8x1xf32> to vector<8x32xf32>
    %9 = arith.subf %2, %8 : vector<8x32xf32>
    %10 = math.exp %9 : vector<8x32xf32>
    %cst_5 = arith.constant dense<0.000000e+00> : vector<8xf32>
    %11 = vector.multi_reduction <add>, %10, %cst_5 [1] : vector<8x32xf32> to vector<8xf32>
    %12 = vector.shape_cast %11 : vector<8xf32> to vector<8x1xf32>
    %13 = math.log %12 : vector<8x1xf32>
    %cst_6 = arith.constant dense<0xFF800000> : vector<8xf32>
    %14 = vector.multi_reduction <maximumf>, %5, %cst_6 [1] : vector<8x32xf32> to vector<8xf32>
    %15 = vector.shape_cast %14 : vector<8xf32> to vector<8x1xf32>
    %16 = vector.broadcast %15 : vector<8x1xf32> to vector<8x32xf32>
    %17 = arith.subf %5, %16 : vector<8x32xf32>
    %18 = math.exp %17 : vector<8x32xf32>
    %cst_7 = arith.constant dense<0.000000e+00> : vector<8xf32>
    %19 = vector.multi_reduction <add>, %18, %cst_7 [1] : vector<8x32xf32> to vector<8xf32>
    %20 = vector.shape_cast %19 : vector<8xf32> to vector<8x1xf32>
    %21 = arith.mulf %18, %9 : vector<8x32xf32>
    %cst_8 = arith.constant dense<0.000000e+00> : vector<8xf32>
    %22 = vector.multi_reduction <add>, %21, %cst_8 [1] : vector<8x32xf32> to vector<8xf32>
    %23 = vector.shape_cast %22 : vector<8xf32> to vector<8x1xf32>
    %24 = tpu.reciprocal %20 {approx = true} : vector<8x1xf32> -> vector<8x1xf32>
    %25 = arith.mulf %23, %24 : vector<8x1xf32>
    %26 = arith.subf %13, %25 : vector<8x1xf32>
    %c0_9 = arith.constant 0 : index
    %c0_10 = arith.constant 0 : index
    %27 = vector.load %arg3[%c0_9, %c0_10] : memref<8x1xf32, #tpu.memory_space<vmem>>, vector<8x1xf32>
    tpu.vector_store %arg3[%c0_9, %c0_10], %26 {strides = array<i32>} : memref<8x1xf32, #tpu.memory_space<vmem>>, vector<8x1xf32>,
    return
  }
  func.func @transform_0(%arg0: i32) -> (i32, i32) {
    %c0_i32 = arith.constant 0 : i32
    %c0_i32_0 = arith.constant 0 : i32
    return %arg0, %c0_i32 : i32, i32
  }
  func.func @transform_1(%arg0: i32) -> (i32, i32) {
    %c0_i32 = arith.constant 0 : i32
    %c0_i32_0 = arith.constant 0 : i32
    return %arg0, %c0_i32 : i32, i32
  }
  func.func @transform_2(%arg0: i32) -> (i32, i32) {
    %c0_i32 = arith.constant 0 : i32
    %c0_i32_0 = arith.constant 0 : i32
    return %arg0, %c0_i32 : i32, i32
  }
}

</mosaic_0001>

<bundles_post_ra>
// kernel: tpu_custom_call.1
= control target key start
LH: loop header
LB: loop body
LE: loop exit
PB: predicated region body
PF: predicated region fallthrough
CT: control target
= control target key end

     0   :  { %7 = vsyncpa [#allocation3], 0  ;;  %s160_s0 = inlined_call_operand.hbm [shape: f32[8,32], index: 0, kind: input, shape index: {}]   ;;  %s161_s1 = inlined_call_operand.hbm [shape: f32[8,32], index: 1, kind: input, shape index: {}]   ;;  %s162_s2 = inlined_call_operand.vmem [shape: f32[8,1], index: 2, kind: output, shape index: {}]  }
   0x1   :  { %8 = vsyncpa [#allocation5], 0  ;;  %s129_s9 = smov [#allocation2]   ;;  %s130_s11 = smov [#allocation4]  }
   0x2   :  { %s15_s10 = sshll.u32 %s129_s9, 4  ;;  %s25_s12 = sshll.u32 %s130_s11, 4  ;;  %s16_s10 = int_to_ptr.vmem [resolvable:$true] %s15_s10  ;;  %s26_s12 = int_to_ptr.vmem [resolvable:$true] %s25_s12 }
   0x3   :  { %s93_s13 = scalar_lea.vmem %s16_s10, 128  ;;  %p98_p1 = scmp.lt.s32.totalorder %s16_s10, %s16_s10 }
   0x4   :  { %p94_p0 = scmp.ne.s32.totalorder %s16_s10, %s93_s13  ;;  %p99_p2 = scmp.lt.s32.totalorder %s93_s13, %s93_s13 }
   0x6   :  { %p100_p3 = por %p99_p2, %p98_p1 }
   0x8   :  { %p101_p4 = pnand %p100_p3, %p94_p0 }
   0xa   :  { %104 = shalt.err (!%p101_p4)
}
   0xb   :  { %18 = dma.hbm_to_vmem [thread:$0]  %s160_s0, 128, %s16_s10, [#allocation3]  }
   0xc   :  { %s113_s16 = scalar_lea.vmem %s26_s12, 128  ;;  %p118_p6 = scmp.lt.s32.totalorder %s26_s12, %s26_s12 }
   0xd   :  { %p114_p5 = scmp.ne.s32.totalorder %s26_s12, %s113_s16  ;;  %p119_p7 = scmp.lt.s32.totalorder %s113_s16, %s113_s16 }
   0xf   :  { %p120_p8 = por %p119_p7, %p118_p6 }
  0x11   :  { %p121_p9 = pnand %p120_p8, %p114_p5 }
  0x13   :  { %124 = shalt.err (!%p121_p9)
}
  0x14   :  { %28 = dma.hbm_to_vmem [thread:$0]  %s161_s1, 128, %s26_s12, [#allocation5]  }
  0x15   :  { %125 = dma.done.wait [#allocation3], 128  }
  0x16   :  { %126 = vsyncadd [#allocation3], 4294967168 }
  0x17   :  { %127 = dma.done.wait [#allocation5], 128  }
  0x18   :  { %128 = vsyncadd [#allocation5], 4294967168  ;;  %v35_v0 = vld [vmem:[#allocation2] sm:$0xff]  ;;  %vm39_vm0 = vcmask 261120   ;;  %v37_v1 = vld [vmem:[#allocation4] sm:$0xff]  ;;  %vm67_vm1 = vcmask 7168  }
  0x19   :  { %v36_v2 = vmul.f32 0.33333334, %v35_v0  ;;  %v38_v3 = vmul.f32 0.33333334, %v37_v1 }
  0x1b   :  { %v40_v4 = vsel %vm39_vm0, %v36_v2, -inf  ;;  %v51_v5 = vsel %vm39_vm0, %v38_v3, -inf }
  0x1c   :  { %41 = vmax.xlane.f32.xlu0 %v40_v4 }
  0x20   :  { %52 = vmax.xlane.f32.xlu0 %v51_v5 }
  0xa5   :  { %v42_v6 = vpop.xlane.xlu0 %41 }
  0xa6   :  { %v43_v7 = vsub.f32 %v36_v2, %v42_v6 }
  0xa8   :  { %v44_v8 = vmul.f32 1.442695, %v43_v7 }
  0xa9   :  { %v53_v9 = vpop.xlane.xlu0 %52 }
  0xaa   :  { %77 = vpow2.f32 %v44_v8  ;;  %v54_v10 = vsub.f32 %v38_v3, %v53_v9 }
  0xac   :  { %v55_v11 = vmul.f32 1.442695, %v54_v10 }
  0xae   :  { %79 = vpow2.f32 %v55_v11 }
  0xb7   :  { %v78_v12 = vpop.eup %77 }
  0xb8   :  { %v46_v13 = vsel %vm39_vm0, %v78_v12, 0.0 }
  0xb9   :  { %47 = vadd.xlane.f32.xlu1 %v46_v13 }
  0xbb   :  { %v80_v14 = vpop.eup %79 }
  0xbc   :  { %v57_v15 = vsel %vm39_vm0, %v80_v14, 0.0  ;;  %v60_v16 = vmul.f32 %v80_v14, %v43_v7 }
  0xbd   :  { %58 = vadd.xlane.f32.xlu1 %v57_v15 }
  0xbe   :  { %v61_v17 = vsel %vm39_vm0, %v60_v16, 0.0 }
  0xbf   :  { %62 = vadd.xlane.f32.xlu0 %v61_v17 }
 0x142   :  { %v48_v18 = vpop.xlane.xlu1 %47 }
 0x143   :  { %81 = vlog2.f32 %v48_v18 }
 0x146   :  { %v59_v19 = vpop.xlane.xlu1 %58 }
 0x147   :  { %83 = vrcp.f32 %v59_v19 }
 0x148   :  { %v63_v22 = vpop.xlane.xlu0 %62 }
 0x150   :  { %v82_v20 = vpop.eup %81 }
 0x151   :  { %v50_v23 = vmul.f32 0.6931472, %v82_v20 }
 0x154   :  { %v84_v21 = vpop.eup %83 }
 0x155   :  { %v65_v24 = vmul.f32 %v84_v21, %v63_v22 }
 0x157   :  { %v66_v25 = vsub.f32 %v50_v23, %v65_v24 }
 0x159   :  { %68 = vst.msk [vmem:[%s162_s2] sm:$0xff] %vm67_vm1, %v66_v25 }
 0x15a   :  { %73 = vsyncpa [#allocation3], 1 }
 0x15b   :  { %74 = vsyncpa [#allocation5], 1 }

</bundles_post_ra>
